<compile_context>
chip_gen: v5e
topology: v5e:2x2
jax: 0.10.0
libtpu: 0.0.40
codegen_flags: <defaults>
</compile_context>

<pallas_src>
import functools

import numpy as np
import jax
import jax.numpy as jnp
from jax.experimental import pallas as pl
from jax.experimental.pallas import tpu as pltpu

BN_EPS = 1e-5
_MIN_LANES = 128   # flattened pixel axis of every pyramid level is padded to >= one vreg
_CIN_PAD = 8       # network input (3 ch) zero-padded to 8 so all sublane concats align

# ------------------------- fixed operand ordering ------------------------------
PACK_KEYS = []
for _blk in ("inc", "down1", "down2", "down3", "up1", "up2", "up3"):
    PACK_KEYS += [f"{_blk}_1_w", f"{_blk}_1_b", f"{_blk}_2_w", f"{_blk}_2_b"]
PACK_KEYS += ["outc_w", "outc_b", "s_w", "s_b"]

CONST_KEYS = ([f"mask{l}" for l in range(4)]
              + [f"pool{l}" for l in range(3)]
              + [f"upc{l}" for l in range(3)])


# ------------------------- lane-roll helper ------------------------------------
@functools.lru_cache(maxsize=None)
def _lane_roll():
    """Return shift(x, off) with shift(x, off)[:, p] == x[:, (p + off) % P] (2-D, lane axis).

    pltpu.roll is probed once (tiny pallas_call) to pin down the rotation direction of the
    hardware op; if the probe cannot run, fall back to jnp.roll (always correct, slower).
    """
    try:
        def _probe(x_ref, o_ref):
            o_ref[...] = pltpu.roll(x_ref[...], 1, axis=1)

        probe_in = jnp.arange(128, dtype=jnp.float32).reshape(1, 128)
        probe_out = pl.pallas_call(
            _probe, out_shape=jax.ShapeDtypeStruct((1, 128), jnp.float32))(probe_in)
        sign = 1 if float(probe_out[0, 127]) == 126.0 else -1
        return lambda x, off: pltpu.roll(x, ((-off) * sign) % x.shape[1], axis=1)
    except Exception:  # defensive fallback, keeps semantics identical
        return lambda x, off: jnp.roll(x, -off, axis=1)


# ------------------------- constant matrices (numpy, trace-time) ---------------
def _ppad(h, w):
    return max(h * w, _MIN_LANES)


def _upmat_np(n):
    """(2n, n) bilinear x2 interpolation matrix, align_corners=True (PyTorch Upsample)."""
    no = 2 * n
    if n == 1:
        return np.ones((no, 1), np.float32)
    src = np.arange(no, dtype=np.float64) * (n - 1) / (no - 1)
    lo = np.clip(np.floor(src).astype(np.int64), 0, n - 2)
    frac = src - lo
    a = np.zeros((no, n), np.float64)
    a[np.arange(no), lo] += 1.0 - frac
    a[np.arange(no), lo + 1] += frac
    return a.astype(np.float32)


def _masks_np(h, w):
    """(9, 1, Ppad) multiplicative validity masks for the 9 taps of a 'same' 3x3 conv.

    Zero beyond h*w lanes: this is the pad-lane-hygiene invariant every consumer relies on.
    """
    pp = _ppad(h, w)
    hh, ww = np.meshgrid(np.arange(h), np.arange(w), indexing="ij")
    m = np.zeros((9, 1, pp), np.float32)
    t = 0
    for dh in (-1, 0, 1):
        for dw in (-1, 0, 1):
            valid = ((hh + dh >= 0) & (hh + dh < h) & (ww + dw >= 0) & (ww + dw < w))
            m[t, 0, :h * w] = valid.reshape(-1)
            t += 1
    return m


def _pool_np(h, w):
    """(Ppad_in, Ppad_out) 0/1 selection matrix: picks the top-left lane of each 2x2 window."""
    ho, wo = h // 2, w // 2
    s = np.zeros((_ppad(h, w), _ppad(ho, wo)), np.float32)
    for i in range(ho):
        for j in range(wo):
            s[(2 * i) * w + 2 * j, i * wo + j] = 1.0
    return s


def _upsample_np(h, w):
    """(Ppad_in, Ppad_out) bilinear x2 (align_corners=True) matrix: level (h,w)->(2h,2w)."""
    ah, aw = _upmat_np(h), _upmat_np(w)
    u = np.einsum("Ii,Jj->ijIJ", ah, aw).reshape(h * w, 4 * h * w)
    out = np.zeros((_ppad(h, w), _ppad(2 * h, 2 * w)), np.float32)
    out[:h * w, :4 * h * w] = u
    return out


def _build_consts(H, W):
    dims = [(H >> l, W >> l) for l in range(4)]
    c = {}
    for l, (h, w) in enumerate(dims):
        c[f"mask{l}"] = _masks_np(h, w)
    for l in range(3):
        c[f"pool{l}"] = _pool_np(*dims[l])          # level l -> l+1
    for l in range(3):
        c[f"upc{l}"] = _upsample_np(*dims[l + 1])   # level l+1 -> l
    return c


# ------------------------- parameter packing (BN folded into weights) ----------
def _fold_conv_bn(conv, bn=None, cin_pad=None):
    """Fold eval-mode BN into the conv; return lane-dense ((Cout, K*K*Cin) weight, (Cout,1) bias).

    Column order of the weight is (tap, cin) with tap = (dh+1)*3 + (dw+1), matching the
    in-kernel sublane stacking order.
    """
    w, b = conv["w"].astype(jnp.float32), conv["b"].astype(jnp.float32)   # (k,k,Cin,Cout)
    k, cin, cout = w.shape[0], w.shape[2], w.shape[3]
    if bn is not None:
        scale = bn["gamma"] * jax.lax.rsqrt(bn["var"] + BN_EPS)
        w = w * scale
        b = (b - bn["mean"]) * scale + bn["beta"]
    if cin_pad is not None and cin_pad > cin:
        w = jnp.pad(w, ((0, 0), (0, 0), (0, cin_pad - cin), (0, 0)))
        cin = cin_pad
    wt = jnp.transpose(w, (3, 0, 1, 2)).reshape(cout, k * k * cin)
    return wt, jnp.reshape(b, (cout, 1)).astype(jnp.float32)


def _pack_params(params):
    p = {}

    def fold_bf16(conv, bn, cin_pad=None):
        w, b = _fold_conv_bn(conv, bn, cin_pad)
        return w.astype(jnp.bfloat16), b

    p["inc_1_w"], p["inc_1_b"] = fold_bf16(params["inc"]["conv1"], params["inc"]["bn1"],
                                           cin_pad=_CIN_PAD)
    p["inc_2_w"], p["inc_2_b"] = fold_bf16(params["inc"]["conv2"], params["inc"]["bn2"])
    for blk in ("down1", "down2", "down3", "up1", "up2", "up3"):
        p[f"{blk}_1_w"], p[f"{blk}_1_b"] = fold_bf16(params[blk]["conv1"], params[blk]["bn1"])
        p[f"{blk}_2_w"], p[f"{blk}_2_b"] = fold_bf16(params[blk]["conv2"], params[blk]["bn2"])
    ow, ob = _fold_conv_bn(params["outc"])
    p["outc_w"], p["outc_b"] = ow.astype(jnp.bfloat16), ob
    sw, sb = _fold_conv_bn(params["s"])
    p["s_w"], p["s_b"] = sw.astype(jnp.float32), sb      # tiny 1x1 conv stays f32
    return p


# ------------------------- the fused Pallas kernel -----------------------------
def _denoise_kernel(*refs, W):
    it = iter(refs)
    x_ref = next(it)
    prm = {k: next(it) for k in PACK_KEYS}
    cst = {k: next(it) for k in CONST_KEYS}
    o_nhat, o_ntilde, o_cont1, o_cont2 = (next(it) for _ in range(4))

    f32, bf16 = jnp.float32, jnp.bfloat16
    shift = _lane_roll()

    def conv3x3(x, name_w, name_b, mask_key, row_w, relu):
        """3x3 'same' conv as ONE stacked-K MXU dot (K = 9*Cin).

        Pad-lane hygiene: output lanes >= h*w hold finite bias garbage; every consumer
        (tap masks, zero rows/cols of the pool/upsample matrices) zeroes them out.
        """
        w_ref, b_ref, m_ref = prm[name_w], prm[name_b], cst[mask_key]
        taps = []
        t = 0
        for dh in (-1, 0, 1):
            for dw in (-1, 0, 1):
                off = dh * row_w + dw
                if off == 0:
                    taps.append(x)                       # center tap: no boundary crossed
                else:
                    taps.append(shift(x, off) * m_ref[t])
                t += 1
        stacked = jnp.concatenate(taps, axis=0).astype(bf16)     # (9*Cin, Ppad), aligned
        acc = jnp.dot(w_ref[...], stacked, preferred_element_type=f32) + b_ref[...]
        return jnp.maximum(acc, 0.0) if relu else acc

    def double_conv(x, name, mask_key, row_w):
        h = conv3x3(x, f"{name}_1_w", f"{name}_1_b", mask_key, row_w, True)
        return conv3x3(h, f"{name}_2_w", f"{name}_2_b", mask_key, row_w, True)

    def maxpool(x, pool_key, row_w):
        m = jnp.maximum(jnp.maximum(x, shift(x, 1)),
                        jnp.maximum(shift(x, row_w), shift(x, row_w + 1)))
        # exact 0/1 gather; zero columns keep the pooled tile's pad lanes clean
        return jnp.dot(m, cst[pool_key][...], preferred_element_type=f32)

    def up_block(x_deep, x_skip, name, up_key, mask_key, row_w):
        # bilinear x2 (align_corners=True) as a constant-matrix gather; the channel
        # concat [skip, upsampled] feeds the stacked-K conv directly (aligned concat).
        x_up = jnp.dot(x_deep, cst[up_key][...], preferred_element_type=f32)
        x_cat = jnp.concatenate([x_skip, x_up], axis=0)
        h = conv3x3(x_cat, f"{name}_1_w", f"{name}_1_b", mask_key, row_w, True)
        return conv3x3(h, f"{name}_2_w", f"{name}_2_b", mask_key, row_w, True)

    x8 = x_ref[0]                       # (8, H*W): 3 real channels + 5 zero pad rows
    x_rgb = x8[:3, :]
    w0, w1, w2, w3 = W, W // 2, W // 4, W // 8

    fi = double_conv(x8, "inc", "mask0", w0)
    d1 = double_conv(maxpool(fi, "pool0", w0), "down1", "mask1", w1)
    d2 = double_conv(maxpool(d1, "pool1", w1), "down2", "mask2", w2)
    d3 = double_conv(maxpool(d2, "pool2", w2), "down3", "mask3", w3)

    u = up_block(d3, d2, "up1", "upc2", "mask2", w2)
    u = up_block(u, d1, "up2", "upc1", "mask1", w1)
    ff3 = up_block(u, fi, "up3", "upc0", "mask0", w0)

    cont1 = conv3x3(ff3, "outc_w", "outc_b", "mask0", w0, False)
    n_hat = x_rgb - cont1
    n_tilde = jnp.dot(prm["s_w"][...], n_hat, preferred_element_type=f32) + prm["s_b"][...]
    cont2 = x_rgb - n_tilde

    o_nhat[0] = n_hat
    o_ntilde[0] = n_tilde
    o_cont1[0] = cont1
    o_cont2[0] = cont2


# ------------------------- cost estimate ----------------------------------------
def _estimate_cost(N, H, W, f):
    dims = [(H >> l, W >> l) for l in range(4)]
    pp = [_ppad(h, w) for h, w in dims]
    convs = [(_CIN_PAD, f, 0), (f, f, 0),
             (f, 2 * f, 1), (2 * f, 2 * f, 1),
             (2 * f, 4 * f, 2), (4 * f, 4 * f, 2),
             (4 * f, 4 * f, 3), (4 * f, 4 * f, 3),
             (8 * f, 2 * f, 2), (2 * f, 2 * f, 2),
             (4 * f, f, 1), (f, f, 1),
             (2 * f, f, 0), (f, f, 0),
             (f, 3, 0)]
    flops = sum(2 * 9 * ci * co * pp[l] for ci, co, l in convs) + 2 * 3 * 3 * pp[0]
    for l, c in enumerate((f, 2 * f, 4 * f)):          # maxpool gather matmuls
        flops += 2 * c * pp[l] * pp[l + 1]
    for l, c in zip((2, 1, 0), (4 * f, 2 * f, f)):     # bilinear upsample matmuls
        flops += 2 * c * pp[l + 1] * pp[l]
    flops *= N
    w_bytes = 2 * sum(9 * ci * co for ci, co, _ in convs)
    c_bytes = 4 * (9 * sum(pp) + 2 * sum(pp[l] * pp[l + 1] for l in range(3)))
    io_bytes = 4 * N * pp[0] * (_CIN_PAD + 4 * 3)
    return pl.CostEstimate(flops=int(flops), transcendentals=0,
                           bytes_accessed=int(w_bytes + c_bytes + io_bytes))


# ------------------------- wrapper ----------------------------------------------
def denoisenet_forward(params, input_nchw):
    N, Cin, H, W = input_nchw.shape
    assert Cin == 3, "denoisenet expects 3 input channels"
    assert H % 8 == 0 and W % 8 == 0, "spatial dims must be divisible by 8 (3 poolings)"
    hw = H * W
    assert hw >= _MIN_LANES, "H*W must be >= 128 (level-0 tile is unpadded)"
    feature_num = params["inc"]["conv1"]["w"].shape[-1]
    assert feature_num % 8 == 0, "feature_num must be a multiple of 8 (aligned concats)"

    packed = _pack_params(params)
    consts = _build_consts(H, W)

    x_flat = input_nchw.reshape(N, 3, hw).astype(jnp.float32)
    x_pad = jnp.concatenate(
        [x_flat, jnp.zeros((N, _CIN_PAD - 3, hw), jnp.float32)], axis=1)

    operands = ([x_pad]
                + [packed[k] for k in PACK_KEYS]
                + [jnp.asarray(consts[k]) for k in CONST_KEYS])

    def _fixed(n, *, nd):
        return (0,) * nd

    in_specs = [pl.BlockSpec((1, _CIN_PAD, hw), lambda n: (n, 0, 0))]
    in_specs += [pl.BlockSpec(op.shape, functools.partial(_fixed, nd=op.ndim))
                 for op in operands[1:]]

    out_shape = tuple(jax.ShapeDtypeStruct((N, 3, hw), jnp.float32) for _ in range(4))
    out_specs = tuple(pl.BlockSpec((1, 3, hw), lambda n: (n, 0, 0)) for _ in range(4))

    outs = pl.pallas_call(
        functools.partial(_denoise_kernel, W=W),
        grid=(N,),                       # one image per grid step; batch>=2 fills v7x's 2 TCs
        in_specs=in_specs,
        out_specs=out_specs,
        out_shape=out_shape,
        compiler_params=pltpu.CompilerParams(
            dimension_semantics=("parallel",),
            vmem_limit_bytes=64 * 1024 * 1024),
        cost_estimate=_estimate_cost(N, H, W, feature_num),
    )(*operands)

    return tuple(o.reshape(N, 3, H, W) for o in outs)   # (n_hat, n_tilde, cont1, cont2)


# ------------------------- parameters -------------------------------------------
def _conv_params(key, k, cin, cout):
    kw_, kb_ = jax.random.split(key)
    w = jax.random.normal(kw_, (k, k, cin, cout), jnp.float32) * (0.3 / (k * k * cin) ** 0.5)
    b = 0.01 * jax.random.normal(kb_, (cout,), jnp.float32)
    return {"w": w, "b": b}


def _bn_params(key, c):
    k1, k2, k3, k4 = jax.random.split(key, 4)
    return {
        "gamma": 1.0 + 0.1 * jax.random.normal(k1, (c,), jnp.float32),
        "beta": 0.1 * jax.random.normal(k2, (c,), jnp.float32),
        "mean": 0.1 * jax.random.normal(k3, (c,), jnp.float32),
        "var": jax.random.uniform(k4, (c,), jnp.float32, minval=0.5, maxval=1.5),
    }


def _double_conv_params(key, cin, cout):
    k1, k2, k3, k4 = jax.random.split(key, 4)
    return {
        "conv1": _conv_params(k1, 3, cin, cout), "bn1": _bn_params(k2, cout),
        "conv2": _conv_params(k3, 3, cout, cout), "bn2": _bn_params(k4, cout),
    }


def init_params(key, feature_num=8):
    keys = jax.random.split(key, 9)
    f = feature_num
    return {
        "inc":   _double_conv_params(keys[0], 3, f),
        "down1": _double_conv_params(keys[1], f, 2 * f),
        "down2": _double_conv_params(keys[2], 2 * f, 4 * f),
        "down3": _double_conv_params(keys[3], 4 * f, 4 * f),
        "up1":   _double_conv_params(keys[4], 8 * f, 2 * f),
        "up2":   _double_conv_params(keys[5], 4 * f, f),
        "up3":   _double_conv_params(keys[6], 2 * f, f),
        "outc":  _conv_params(keys[7], 3, f, 3),
        "s":     _conv_params(keys[8], 1, 3, 3),
    }


# ------------------------- pure-JAX reference (for the self-check) --------------
def _ref_conv(x, conv, bn=None, relu=False, mxu_dtype=jnp.bfloat16):
    """Conv + folded eval-BN; mxu_dtype mirrors the kernel's MXU operand precision."""
    w, b = conv["w"].astype(jnp.float32), conv["b"].astype(jnp.float32)
    if bn is not None:
        scale = bn["gamma"] * jax.lax.rsqrt(bn["var"] + BN_EPS)
        w = w * scale
        b = (b - bn["mean"]) * scale + bn["beta"]
    prec = jax.lax.Precision.HIGHEST if mxu_dtype == jnp.float32 else None
    y = jax.lax.conv_general_dilated(
        x.astype(mxu_dtype), w.astype(mxu_dtype), (1, 1), "SAME",
        dimension_numbers=("NHWC", "HWIO", "NHWC"),
        preferred_element_type=jnp.float32,
        precision=prec)
    y = y + b
    return jnp.maximum(y, 0.0) if relu else y


def denoisenet_reference(params, input_nchw, mxu_dtype=jnp.bfloat16):
    x = jnp.transpose(input_nchw, (0, 2, 3, 1)).astype(jnp.float32)

    def dconv(h, p):
        h = _ref_conv(h, p["conv1"], p["bn1"], relu=True, mxu_dtype=mxu_dtype)
        return _ref_conv(h, p["conv2"], p["bn2"], relu=True, mxu_dtype=mxu_dtype)

    def pool(h):
        n, hh, ww, c = h.shape
        return h.reshape(n, hh // 2, 2, ww // 2, 2, c).max(axis=(2, 4))

    def ups(h):
        n, hh, ww, c = h.shape
        ah, aw = jnp.asarray(_upmat_np(hh)), jnp.asarray(_upmat_np(ww))
        t = jnp.einsum("Ii,nijc->nIjc", ah, h, precision=jax.lax.Precision.HIGHEST)
        return jnp.einsum("Jj,nIjc->nIJc", aw, t, precision=jax.lax.Precision.HIGHEST)

    def ublock(x_deep, x_skip, p):
        return dconv(jnp.concatenate([x_skip, ups(x_deep)], axis=-1), p)

    fi = dconv(x, params["inc"])
    x2 = dconv(pool(fi), params["down1"])
    x3 = dconv(pool(x2), params["down2"])
    x4 = dconv(pool(x3), params["down3"])
    u = ublock(x4, x3, params["up1"])
    u = ublock(u, x2, params["up2"])
    ff3 = ublock(u, fi, params["up3"])
    cont1 = _ref_conv(ff3, params["outc"], mxu_dtype=mxu_dtype)
    n_hat = x - cont1
    n_tilde = _ref_conv(n_hat, params["s"], mxu_dtype=jnp.float32)   # 1x1 conv stays f32
    cont2 = x - n_tilde
    to_nchw = lambda t: jnp.transpose(t, (0, 3, 1, 2))
    return tuple(to_nchw(t) for t in (n_hat, n_tilde, cont1, cont2))


# ------------------------- main --------------------------------------------------
if __name__ == "__main__":
    key = jax.random.PRNGKey(0)
    kp, kx = jax.random.split(key)
    params = init_params(kp, feature_num=8)
    input1 = jax.random.normal(kx, (2, 3, 16, 16), jnp.float32)   # NCHW, as in PyTorch

    # Resolve and unit-test the lane-shift convention outside of any trace
    shift = _lane_roll()

    def _shift_probe(x_ref, o_ref):
        o_ref[...] = shift(x_ref[...], 5)

    probe_x = jnp.arange(256, dtype=jnp.float32).reshape(2, 128)
    probe_y = pl.pallas_call(
        _shift_probe, out_shape=jax.ShapeDtypeStruct((2, 128), jnp.float32))(probe_x)
    np.testing.assert_array_equal(np.asarray(probe_y),
                                  np.roll(np.asarray(probe_x), -5, axis=1))

    fwd = jax.jit(denoisenet_forward)
    outs = jax.block_until_ready(fwd(params, input1))

    assert len(outs) == 4
    assert all(o.shape == (2, 3, 16, 16) and o.dtype == jnp.float32 for o in outs)
    assert all(bool(jnp.all(jnp.isfinite(o))) for o in outs)

    # Primary check: reference using the same bf16 MXU operand precision as the kernel.
    refs_bf16 = jax.jit(
        functools.partial(denoisenet_reference, mxu_dtype=jnp.bfloat16))(params, input1)
    for got, want in zip(outs, refs_bf16):
        np.testing.assert_allclose(np.asarray(got), np.asarray(want), atol=3e-2, rtol=0)

    # Secondary check: full-f32 reference of the original module (generous tolerance,
    # demonstrates the bf16-MXU choice does not hurt end-to-end accuracy).
    refs_f32 = jax.jit(
        functools.partial(denoisenet_reference, mxu_dtype=jnp.float32))(params, input1)
    for got, want in zip(outs, refs_f32):
        np.testing.assert_allclose(np.asarray(got), np.asarray(want), atol=1e-1, rtol=0)

    print("KERNEL_OK")
</pallas_src>

<mosaic_0001>
module attributes {stable_mosaic.version = 11 : i64} {
  func.func @_probe(%arg0: memref<1x128xf32, #tpu.memory_space<vmem>>, %arg1: memref<1x128xf32, #tpu.memory_space<vmem>>) attributes {dimension_semantics = [], scalar_prefetch = 0 : i64, scratch_operands = 0 : i64, tpu.core_type = #tpu.core_type<tc>} {
    %c0 = arith.constant 0 : index
    %c0_0 = arith.constant 0 : index
    %0 = vector.load %arg0[%c0, %c0_0] : memref<1x128xf32, #tpu.memory_space<vmem>>, vector<1x128xf32>
    %c1_i32 = arith.constant 1 : i32
    %1 = tpu.dynamic_rotate %0 by %c1_i32 dim 1 : vector<1x128xf32>, i32 -> vector<1x128xf32>
    %c0_1 = arith.constant 0 : index
    %c0_2 = arith.constant 0 : index
    %2 = vector.load %arg1[%c0_1, %c0_2] : memref<1x128xf32, #tpu.memory_space<vmem>>, vector<1x128xf32>
    tpu.vector_store %arg1[%c0_1, %c0_2], %1 {strides = array<i32>} : memref<1x128xf32, #tpu.memory_space<vmem>>, vector<1x128xf32>,
    return
  }
}

module attributes {stable_mosaic.version = 11 : i64} {
  func.func @_shift_probe(%arg0: memref<2x128xf32, #tpu.memory_space<vmem>>, %arg1: memref<2x128xf32, #tpu.memory_space<vmem>>) attributes {dimension_semantics = [], scalar_prefetch = 0 : i64, scratch_operands = 0 : i64, tpu.core_type = #tpu.core_type<tc>} {
    %c0 = arith.constant 0 : index
    %c0_0 = arith.constant 0 : index
    %0 = vector.load %arg0[%c0, %c0_0] : memref<2x128xf32, #tpu.memory_space<vmem>>, vector<2x128xf32>
    %1 = vector.extract_strided_slice %0 {offsets = [0, 5], sizes = [2, 123], strides = [1, 1]} : vector<2x128xf32> to vector<2x123xf32>
    %2 = vector.extract_strided_slice %0 {offsets = [0, 0], sizes = [2, 5], strides = [1, 1]} : vector<2x128xf32> to vector<2x5xf32>
    %3 = tpu.concatenate %1, %2 in 1 : vector<2x123xf32>, vector<2x5xf32> -> vector<2x128xf32>
    %c0_1 = arith.constant 0 : index
    %c0_2 = arith.constant 0 : index
    %4 = vector.load %arg1[%c0_1, %c0_2] : memref<2x128xf32, #tpu.memory_space<vmem>>, vector<2x128xf32>
    tpu.vector_store %arg1[%c0_1, %c0_2], %3 {strides = array<i32>} : memref<2x128xf32, #tpu.memory_space<vmem>>, vector<2x128xf32>,
    return
  }
}

</mosaic_0001>

<bundles_post_ra>
// kernel: tpu_custom_call.1
= control target key start
LH: loop header
LB: loop body
LE: loop exit
PB: predicated region body
PF: predicated region fallthrough
CT: control target
= control target key end

     0   :  { %6 = vsyncpa [#allocation3], 0  ;;  %s118_s0 = inlined_call_operand.hbm [shape: f32[1,128], index: 0, kind: input, shape index: {}]   ;;  %s119_s1 = inlined_call_operand.hbm [shape: f32[1,128], index: 1, kind: output, shape index: {}]  }
   0x1   :  { %7 = vsyncpa [#allocation4], 0  ;;  %s13_s8 = sshll.u32 %s118_s0, 4  ;;  %s99_s9 = smov [#allocation2]   ;;  %s14_s8 = int_to_ptr.hbm [resolvable:$true] %s13_s8 }
   0x2   :  { %s15_s10 = sshll.u32 %s99_s9, 4  ;;  %s16_s10 = int_to_ptr.vmem [resolvable:$true] %s15_s10 }
   0x3   :  { %18 = dma.hbm_to_vmem [thread:$0]  %s14_s8, 16, %s16_s10, [#allocation3]  }
   0x4   :  { %95 = dma.done.wait [#allocation3], 16  }
   0x5   :  { %96 = vsyncadd [#allocation3], 4294967280  ;;  %v23_v0 = vld [vmem:[#allocation2] sm:$0x1]  ;;  %s100_s11 = smov 1   ;;  %s101_s12 = smov [#allocation5]  }
   0x6   :  { %24 = vrot.lane.b32.xlu0 %v23_v0, %s100_s11  ;;  %s32_s13 = sshll.u32 %s101_s12, 4  ;;  %s34_s16 = sshll.u32 %s119_s1, 4  ;;  %s33_s13 = int_to_ptr.vmem [resolvable:$true] %s32_s13  ;;  %s35_s16 = int_to_ptr.hbm [resolvable:$true] %s34_s16 }
  0x78   :  { %v25_v1 = vpop.permute.xlu0 %24 }
  0x79   :  { %26 = vst [vmem:[#allocation5] sm:$0x1] %v25_v1 }
  0x7a   :  { %37 = dma.vmem_to_hbm [thread:$0]  %s33_s13, 16, %s35_s16, [#allocation4]  }
  0x7b   :  { %97 = dma.done.wait [#allocation4], 16  }
  0x7c   :  { %98 = vsyncadd [#allocation4], 4294967280 }
  0x7d   :  { %42 = vsyncpa [#allocation3], 1 }
  0x7e   :  { %43 = vsyncpa [#allocation4], 1 }

// kernel: tpu_custom_call.1
= control target key start
LH: loop header
LB: loop body
LE: loop exit
PB: predicated region body
PF: predicated region fallthrough
CT: control target
= control target key end

     0   :  { %6 = vsyncpa [#allocation3], 0  ;;  %s120_s0 = inlined_call_operand.hbm [shape: f32[2,128], index: 0, kind: input, shape index: {}]   ;;  %s121_s1 = inlined_call_operand.hbm [shape: f32[2,128], index: 1, kind: output, shape index: {}]  }
   0x1   :  { %7 = vsyncpa [#allocation4], 0  ;;  %s13_s8 = sshll.u32 %s120_s0, 4  ;;  %s101_s9 = smov [#allocation2]   ;;  %s14_s8 = int_to_ptr.hbm [resolvable:$true] %s13_s8 }
   0x2   :  { %s15_s10 = sshll.u32 %s101_s9, 4  ;;  %s16_s10 = int_to_ptr.vmem [resolvable:$true] %s15_s10 }
   0x3   :  { %18 = dma.hbm_to_vmem [thread:$0]  %s14_s8, 32, %s16_s10, [#allocation3]  }
   0x4   :  { %97 = dma.done.wait [#allocation3], 32  }
   0x5   :  { %98 = vsyncadd [#allocation3], 4294967264  ;;  %v23_v0 = vld [vmem:[#allocation2] sm:$0x3]  ;;  %s102_s11 = smov 123   ;;  %s103_s12 = smov [#allocation5]  }
   0x6   :  { %25 = vrot.lane.b32.xlu0 %v23_v0, %s102_s11  ;;  %s34_s13 = sshll.u32 %s103_s12, 4  ;;  %s36_s16 = sshll.u32 %s121_s1, 4  ;;  %s35_s13 = int_to_ptr.vmem [resolvable:$true] %s34_s13  ;;  %s37_s16 = int_to_ptr.hbm [resolvable:$true] %s36_s16 }
  0x78   :  { %v26_v1 = vpop.permute.xlu0 %25 }
  0x79   :  { %28 = vst [vmem:[#allocation5] sm:$0x3] %v26_v1 }
  0x7a   :  { %39 = dma.vmem_to_hbm [thread:$0]  %s35_s13, 32, %s37_s16, [#allocation4]  }
  0x7b   :  { %99 = dma.done.wait [#allocation4], 32  }
  0x7c   :  { %100 = vsyncadd [#allocation4], 4294967264 }
  0x7d   :  { %44 = vsyncpa [#allocation3], 1 }
  0x7e   :  { %45 = vsyncpa [#allocation4], 1 }

</bundles_post_ra>
